<compile_context>
chip_gen: v6e
topology: v6e:2x2x1
jax: 0.10.0
libtpu: 0.0.40
codegen_flags: <defaults>
</compile_context>

<pallas_src>
import jax
import jax.numpy as jnp
from jax.experimental import pallas as pl
from jax.experimental.pallas import tpu as pltpu

_LANE = 128      # vreg lane width
_SUBLANE = 8     # vreg sublane count


def _round_up(n, m):
    return ((n + m - 1) // m) * m


# ----------------------------------------------------------------------------------------------
# Kernels
# ----------------------------------------------------------------------------------------------
def _linear_kernel(x_ref, w_ref, b_ref, o_ref):
    """Single-K-step linear tile: one MXU matmul, f32 accumulate, bias add, one cast, one
    lane-dense store."""
    acc = jnp.dot(x_ref[...], w_ref[...], preferred_element_type=jnp.float32)
    o_ref[...] = (acc + b_ref[...]).astype(o_ref.dtype)


def _linear_kernel_ktiled(x_ref, w_ref, b_ref, o_ref, acc_ref):
    """K-tiled linear tile: f32 VMEM accumulator; zero-init at k==0, bias+cast+store at k==last."""
    k = pl.program_id(2)

    @pl.when(k == 0)
    def _init():
        acc_ref[...] = jnp.zeros_like(acc_ref)

    acc_ref[...] += jnp.dot(x_ref[...], w_ref[...], preferred_element_type=jnp.float32)

    @pl.when(k == pl.num_programs(2) - 1)
    def _finalize():
        o_ref[...] = (acc_ref[...] + b_ref[...]).astype(o_ref.dtype)


# ----------------------------------------------------------------------------------------------
# Tiling plan + one-time parameter prep (hoisted out of the per-call forward)
# ----------------------------------------------------------------------------------------------
def _plan_nk(in_size, out_size):
    """N/K tiling derived from parameter shapes only (so prep and forward agree)."""
    # N (output lanes): pad to the 128-lane boundary, tile at <= 512 (a multiple of 256 feeds the
    # 256-wide MXU on v6e/v7x; 128-multiples are enough for v5e). Lane-dense stores throughout.
    n_pad = _round_up(out_size, _LANE)
    tn = min(512, n_pad)
    # K (contraction): keep un-tiled -- no padding of x needed -- unless in_size is large enough
    # that the resident (K, tn) weight slab plus x tiles would pressure VMEM; then tile K at 512.
    if in_size <= 2048:
        k_pad, tk = in_size, in_size
    else:
        tk = 512
        k_pad = _round_up(in_size, tk)
    return n_pad, tn, k_pad, tk


def prepare_linear_params(weight, bias, compute_dtype=jnp.bfloat16):
    """One-time parameter prep -- call once at init time, NOT on every forward.

    * Transposes PyTorch-layout (out, in) W to NN layout (in, out) so the kernel never needs an
      in-kernel (XLU) transpose.
    * Zero-pads out_size (lanes) to a multiple of 128, and in_size only if K will be grid-tiled
      (zero padding is contraction-neutral).
    * Casts W to the MXU-native compute dtype (bf16 by default; pass jnp.float32 for exact
      nn.Linear numerics). Bias stays f32: it is added to the f32 accumulator.
    """
    out_size, in_size = weight.shape
    n_pad, tn, k_pad, tk = _plan_nk(in_size, out_size)

    w_kn = jnp.transpose(weight).astype(compute_dtype)                      # (in, out)
    w_kn = jnp.pad(w_kn, ((0, k_pad - in_size), (0, n_pad - out_size)))     # (k_pad, n_pad)
    bias_p = jnp.pad(bias.astype(jnp.float32).reshape(1, out_size),
                     ((0, 0), (0, n_pad - out_size)))                       # (1, n_pad), f32

    return dict(w_kn=w_kn, bias=bias_p, in_size=in_size, out_size=out_size, tn=tn, tk=tk)


# ----------------------------------------------------------------------------------------------
# Forward
# ----------------------------------------------------------------------------------------------
def softmax_regressor_forward(x, params):
    """Exactly nn.Linear: y = x @ W.T + b.  x: (B, in_size); returns (B, out_size) in x.dtype."""
    w_kn, bias_p = params["w_kn"], params["bias"]
    in_size, out_size = params["in_size"], params["out_size"]
    tn, tk = params["tn"], params["tk"]
    compute_dtype = w_kn.dtype

    B = x.shape[0]
    assert x.shape[1] == in_size
    k_pad, n_pad = w_kn.shape
    out_dtype = x.dtype

    # Batch tile: multiple of 8 sublanes. 256 keeps (W slab + 2x x tiles + 2x out tiles) well
    # inside v7x's 64 MiB physical VMEM and near the HBM roofline on v5e/v6e.
    tm = min(256, _round_up(max(B, 1), _SUBLANE))
    grid_n = pl.cdiv(n_pad, tn)
    grid_k = k_pad // tk
    grid_m = pl.cdiv(B, tm)
    if grid_n == 1 and grid_m == 1 and B > 2 * _SUBLANE:
        # Give the second TensorCore (v7x megacore) a parallel grid step when N doesn't provide
        # one: split the batch into (at least) two blocks.
        tm = _round_up(pl.cdiv(B, 2), _SUBLANE)
        grid_m = pl.cdiv(B, tm)

    # x only needs a dtype cast; K padding happens only when K is grid-tiled (zero pad is
    # contraction-neutral).  TODO(synk): mask the last K block in-kernel instead of padding x.
    x_c = x.astype(compute_dtype)
    if k_pad != in_size:
        x_c = jnp.pad(x_c, ((0, 0), (0, k_pad - in_size)))

    x_spec = pl.BlockSpec((tm, tk), lambda i, j, k: (i, k))
    b_spec = pl.BlockSpec((1, tn), lambda i, j, k: (0, j))
    o_spec = pl.BlockSpec((tm, tn), lambda i, j, k: (i, j))

    # Single-buffer the weight only when it is grid-invariant (fully resident) and big enough
    # that the saved VMEM matters; otherwise keep default double-buffering for pipelining.
    itemsize = jnp.dtype(compute_dtype).itemsize
    w_invariant = (grid_n == 1 and grid_k == 1)
    if w_invariant and tk * tn * itemsize >= (1 << 20):
        w_spec = pl.BlockSpec((tk, tn), lambda i, j, k: (k, j), pipeline_mode=pl.Buffered(1))
        w_bufs = 1
    else:
        w_spec = pl.BlockSpec((tk, tn), lambda i, j, k: (k, j))
        w_bufs = 2

    # Explicit scoped-VMEM limit sized from the actual buffers, with headroom.
    need = (2 * tm * tk * itemsize                              # x (double buffered)
            + w_bufs * tk * tn * itemsize                       # weight
            + 2 * tn * 4                                        # bias (f32)
            + 2 * tm * tn * jnp.dtype(out_dtype).itemsize       # out (double buffered)
            + (tm * tn * 4 if grid_k > 1 else 0))               # f32 accumulator scratch
    vmem_limit = int(min(100 * 1024 * 1024, max(32 * 1024 * 1024, 2 * need)))

    compiler_params = pltpu.CompilerParams(
        dimension_semantics=("parallel", "parallel", "arbitrary"),
        vmem_limit_bytes=vmem_limit,
    )

    if grid_k == 1:
        out = pl.pallas_call(
            _linear_kernel,
            out_shape=jax.ShapeDtypeStruct((B, n_pad), out_dtype),
            grid=(grid_m, grid_n, grid_k),
            in_specs=[x_spec, w_spec, b_spec],
            out_specs=o_spec,
            compiler_params=compiler_params,
        )(x_c, w_kn, bias_p)
    else:
        out = pl.pallas_call(
            _linear_kernel_ktiled,
            out_shape=jax.ShapeDtypeStruct((B, n_pad), out_dtype),
            grid=(grid_m, grid_n, grid_k),
            in_specs=[x_spec, w_spec, b_spec],
            out_specs=o_spec,
            scratch_shapes=[pltpu.VMEM((tm, tn), jnp.float32)],
            compiler_params=compiler_params,
        )(x_c, w_kn, bias_p)

    # Slice the zero-padded logit columns off (important before any downstream softmax).
    return out[:, :out_size]


# ----------------------------------------------------------------------------------------------
# Demo / self-check
# ----------------------------------------------------------------------------------------------
if __name__ == "__main__":
    key = jax.random.PRNGKey(0)

    # --- SoftMaxRegressor demo shapes: batch=8, in_size=32, out_size=16 ---
    B, in_size, out_size = 8, 32, 16
    kx, kw, kb, k2 = jax.random.split(key, 4)

    bound = 1.0 / jnp.sqrt(jnp.float32(in_size))
    x = jax.random.normal(kx, (B, in_size), dtype=jnp.float32)
    weight = jax.random.uniform(kw, (out_size, in_size), dtype=jnp.float32,
                                minval=-bound, maxval=bound)
    bias = jax.random.uniform(kb, (out_size,), dtype=jnp.float32, minval=-bound, maxval=bound)

    y_ref = x @ weight.T + bias

    # (a) Exact-precision path (f32 operands) -- must match nn.Linear to float tolerance.
    params_f32 = prepare_linear_params(weight, bias, compute_dtype=jnp.float32)
    y_f32 = jax.block_until_ready(softmax_regressor_forward(x, params_f32))
    assert y_f32.shape == (B, out_size)
    assert jnp.allclose(y_f32, y_ref, atol=1e-5, rtol=1e-5)

    # (b) Default perf path: bf16 operands on the MXU, f32 accumulation.
    #     Reference uses the same bf16-rounded inputs so only accumulation order differs.
    params_bf16 = prepare_linear_params(weight, bias)
    y_bf16 = jax.block_until_ready(softmax_regressor_forward(x, params_bf16))
    ref_bf16 = (x.astype(jnp.bfloat16).astype(jnp.float32)
                @ weight.astype(jnp.bfloat16).astype(jnp.float32).T + bias)
    assert jnp.allclose(y_bf16, ref_bf16, atol=1e-3, rtol=1e-3)

    # (c) Shape that exercises the N-tiled + K-tiled accumulator path (grid = (1, 2, 5)).
    B2, in2, out2 = 32, 2560, 1024
    kx2, kw2, kb2 = jax.random.split(k2, 3)
    bound2 = 1.0 / jnp.sqrt(jnp.float32(in2))
    x2 = jax.random.normal(kx2, (B2, in2), dtype=jnp.float32)
    w2 = jax.random.uniform(kw2, (out2, in2), dtype=jnp.float32, minval=-bound2, maxval=bound2)
    b2 = jax.random.uniform(kb2, (out2,), dtype=jnp.float32, minval=-bound2, maxval=bound2)

    params2 = prepare_linear_params(w2, b2)
    y2 = jax.block_until_ready(softmax_regressor_forward(x2, params2))
    ref2 = (x2.astype(jnp.bfloat16).astype(jnp.float32)
            @ w2.astype(jnp.bfloat16).astype(jnp.float32).T + b2)
    assert y2.shape == (B2, out2)
    assert jnp.allclose(y2, ref2, atol=2e-3, rtol=2e-3)

    print("KERNEL_OK")
</pallas_src>

<mosaic_0001>
module attributes {stable_mosaic.version = 11 : i64} {
  func.func @_linear_kernel(%arg0: i32, %arg1: i32, %arg2: i32, %arg3: memref<8x32xf32, #tpu.memory_space<vmem>>, %arg4: memref<32x128xf32, #tpu.memory_space<vmem>>, %arg5: memref<1x128xf32, #tpu.memory_space<vmem>>, %arg6: memref<8x128xf32, #tpu.memory_space<vmem>>) attributes {dimension_semantics = [#tpu.dimension_semantics<parallel>, #tpu.dimension_semantics<parallel>, #tpu.dimension_semantics<arbitrary>], iteration_bounds = array<i64: 1, 1, 1>, scalar_prefetch = 0 : i64, scratch_operands = 0 : i64, tpu.core_type = #tpu.core_type<tc>, window_params = [{transform_indices = @transform_0, window_bounds = array<i64: 8, 32>}, {transform_indices = @transform_1, window_bounds = array<i64: 32, 128>}, {transform_indices = @transform_2, window_bounds = array<i64: 1, 128>}, {transform_indices = @transform_3, window_bounds = array<i64: 8, 128>}]} {
    %c0 = arith.constant 0 : index
    %c0_0 = arith.constant 0 : index
    %0 = vector.load %arg3[%c0, %c0_0] : memref<8x32xf32, #tpu.memory_space<vmem>>, vector<8x32xf32>
    %c0_1 = arith.constant 0 : index
    %c0_2 = arith.constant 0 : index
    %1 = vector.load %arg4[%c0_1, %c0_2] : memref<32x128xf32, #tpu.memory_space<vmem>>, vector<32x128xf32>
    %cst = arith.constant dense<0.000000e+00> : vector<8x128xf32>
    %2 = tpu.matmul %0, %1, %cst {dimension_numbers = #tpu.dot_dimension_numbers<[1], [0], [0], [1], [0, 0, 1, 1], [], []>} : vector<8x32xf32>, vector<32x128xf32>, vector<8x128xf32> -> vector<8x128xf32>
    %c0_3 = arith.constant 0 : index
    %c0_4 = arith.constant 0 : index
    %3 = vector.load %arg5[%c0_3, %c0_4] : memref<1x128xf32, #tpu.memory_space<vmem>>, vector<1x128xf32>
    %4 = vector.broadcast %3 : vector<1x128xf32> to vector<8x128xf32>
    %5 = arith.addf %2, %4 : vector<8x128xf32>
    %c0_5 = arith.constant 0 : index
    %c0_6 = arith.constant 0 : index
    %6 = vector.load %arg6[%c0_5, %c0_6] : memref<8x128xf32, #tpu.memory_space<vmem>>, vector<8x128xf32>
    tpu.vector_store %arg6[%c0_5, %c0_6], %5 {strides = array<i32>} : memref<8x128xf32, #tpu.memory_space<vmem>>, vector<8x128xf32>,
    return
  }
  func.func @transform_0(%arg0: i32, %arg1: i32, %arg2: i32) -> (i32, i32) {
    %c0_i32 = arith.constant 0 : i32
    return %arg0, %arg2 : i32, i32
  }
  func.func @transform_1(%arg0: i32, %arg1: i32, %arg2: i32) -> (i32, i32) {
    %c0_i32 = arith.constant 0 : i32
    return %arg2, %arg1 : i32, i32
  }
  func.func @transform_2(%arg0: i32, %arg1: i32, %arg2: i32) -> (i32, i32) {
    %c0_i32 = arith.constant 0 : i32
    %c0_i32_0 = arith.constant 0 : i32
    return %c0_i32, %arg1 : i32, i32
  }
  func.func @transform_3(%arg0: i32, %arg1: i32, %arg2: i32) -> (i32, i32) {
    %c0_i32 = arith.constant 0 : i32
    return %arg0, %arg1 : i32, i32
  }
}

</mosaic_0001>

<bundles_post_ra>
// kernel: tpu_custom_call.1
= control target key start
LH: loop header
LB: loop body
LE: loop exit
PB: predicated region body
PF: predicated region fallthrough
CT: control target
= control target key end

     0   :  { %8 = vsyncpa [#allocation3], 0  ;;  %s274_s0 = inlined_call_operand.hbm [shape: f32[8,32], index: 0, kind: input, shape index: {}]   ;;  %s275_s1 = inlined_call_operand.hbm [shape: f32[32,128], index: 1, kind: input, shape index: {}]   ;;  %s276_s2 = inlined_call_operand.vmem [shape: f32[1,128], index: 2, kind: input, shape index: {}]   ;;  %s277_s3 = inlined_call_operand.hbm [shape: f32[8,128], index: 3, kind: output, shape index: {}]  }
   0x1   :  { %9 = vsyncpa [#allocation6], 0 }
   0x2   :  { %10 = vsyncpa [#allocation4], 0  ;;  %s235_s12 = smov [#allocation2]   ;;  %s236_s14 = smov [#allocation5]  }
   0x3   :  { %s17_s13 = sshll.u32 %s235_s12, 4  ;;  %s26_s15 = sshll.u32 %s236_s14, 4  ;;  %s18_s13 = int_to_ptr.vmem [resolvable:$true] %s17_s13  ;;  %s27_s15 = int_to_ptr.vmem [resolvable:$true] %s26_s15 }
   0x4   :  { %s177_s16 = scalar_lea.vmem %s18_s13, 128  ;;  %p182_p1 = scmp.lt.s32.totalorder %s18_s13, %s18_s13 }
   0x5   :  { %p178_p0 = scmp.ne.s32.totalorder %s18_s13, %s177_s16  ;;  %p183_p2 = scmp.lt.s32.totalorder %s177_s16, %s177_s16 }
   0x7   :  { %p184_p3 = por %p183_p2, %p182_p1 }
   0x9   :  { %p185_p4 = pnand %p184_p3, %p178_p0 }
   0xb   :  { %188 = shalt.err (!%p185_p4)
}
   0xc   :  { %20 = dma.hbm_to_vmem [thread:$0]  %s274_s0, 128, %s18_s13, [#allocation3]  }
   0xd   :  { %s197_s19 = scalar_lea.vmem %s27_s15, 512  ;;  %p202_p6 = scmp.lt.s32.totalorder %s27_s15, %s27_s15 }
   0xe   :  { %p198_p5 = scmp.ne.s32.totalorder %s27_s15, %s197_s19  ;;  %p203_p7 = scmp.lt.s32.totalorder %s197_s19, %s197_s19 }
  0x10   :  { %p204_p8 = por %p203_p7, %p202_p6 }
  0x12   :  { %p205_p9 = pnand %p204_p8, %p198_p5 }
  0x14   :  { %208 = shalt.err (!%p205_p9)
}
  0x15   :  { %s237_s20 = smov 128   ;;  %s238_s21 = smov 8  }
  0x16   :  { %32 = dma.hbm_to_vmem [thread:$0]  %s275_s1, 512, %s27_s15, [#allocation6], %s237_s20, %s237_s20, %s238_s21  }
  0x17   :  { %229 = dma.done.wait [#allocation3], 128  }
  0x18   :  { %230 = vsyncadd [#allocation3], 4294967168 }
  0x19   :  { %231 = dma.done.wait [#allocation6], 512  }
  0x1a   :  { %232 = vsyncadd [#allocation6], 4294966784  ;;  %v239_v0 = vmov 0.0   ;;  %vm240_vm0 = vmmov 0   ;;  %v45_v1 = vld [vmem:[#allocation5 + $0x18] sm:$0xff]  ;;  %v44_v2 = vld [vmem:[#allocation5 + $0x10] sm:$0xff] }
  0x1b   :  { %151 = vmatprep.subr.mxu0 %v239_v0  ;;  %159 = vmatprep.mubr.msk.f32.mxu0 %vm240_vm0, %v239_v0  ;;  %v43_v3 = vld [vmem:[#allocation5 + $0x8] sm:$0xff]  ;;  %v42_v4 = vld [vmem:[#allocation5] sm:$0xff]  ;;  %v41_v5 = vld [vmem:[#allocation2] sm:$0xff]  ;;  %vm53_vm1 = vcmask 261120   ;;  %s241_s24 = smov [#allocation7]  }
  0x1c   :  { %152 = vmatpush3.msra.mxu0 %v45_v1  ;;  %v144_v6 = vld [vmem:[%s276_s2] ss:$0 sm:$0xff]  ;;  %s134_s25 = sshll.u32 %s241_s24, 4  ;;  %s135_s25 = int_to_ptr.vmem [resolvable:$true] %s134_s25 }
  0x1d   :  { %153 = vmatprep.subr.mxu0 %v239_v0  ;;  %s209_s26 = scalar_lea.vmem %s135_s25, 128  ;;  %p214_p11 = scmp.lt.s32.totalorder %s135_s25, %s135_s25 }
  0x1e   :  { %154 = vmatpush3.msra.mxu0 %v44_v2  ;;  %p210_p10 = scmp.ne.s32.totalorder %s135_s25, %s209_s26  ;;  %p215_p12 = scmp.lt.s32.totalorder %s209_s26, %s209_s26 }
  0x1f   :  { %155 = vmatprep.subr.mxu0 %v239_v0 }
  0x20   :  { %156 = vmatpush3.msra.mxu0 %v43_v3  ;;  %p216_p13 = por %p215_p12, %p214_p11 }
  0x21   :  { %157 = vmatprep.subr.mxu0 %v239_v0 }
  0x22   :  { %158 = vmatpush3.msra.mxu0 %v42_v4  ;;  %p217_p0 = pnand %p216_p13, %p210_p10 }
  0x23   :  { %160 = vmatmul.mubr.msk.f32.vlgmr.msra.gmra.mxu0 %vm53_vm1, %v41_v5 }
  0xe3   :  { %v123_v7 = vpop.f32.mrf.mxu0 }
  0xe4   :  { %v124_v8 = vadd.f32 %v144_v6, %v123_v7 }
  0xe5   :  { %v161_v9 = vpop.f32.mrf.mxu0 }
  0xe6   :  { %127 = vst [vmem:[#allocation7] sm:$0xff] %v124_v8 }
  0xe7   :  { %220 = shalt.err (!%p217_p0)
}
  0xe8   :  { %137 = dma.vmem_to_hbm [thread:$0]  %s135_s25, 128, %s277_s3, [#allocation4]  }
  0xe9   :  { %233 = dma.done.wait [#allocation4], 128  }
  0xea   :  { %234 = vsyncadd [#allocation4], 4294967168 }
  0xeb   :  { %141 = vsyncpa [#allocation3], 1 }
  0xec   :  { %142 = vsyncpa [#allocation6], 1 }
  0xed   :  { %143 = vsyncpa [#allocation4], 1 }

</bundles_post_ra>
